<compile_context>
chip_gen: v7x
topology: tpu7x:2x2x1
jax: 0.10.0
libtpu: 0.0.40
codegen_flags: <defaults>
</compile_context>

<pallas_src>
import jax
import jax.numpy as jnp
from jax.experimental import pallas as pl
from jax.experimental.pallas import tpu as pltpu


def _prior_encoder_kernel(idx_ref, mean_tbl_ref, logsd_tbl_ref, z_ref, out_ref):
    # idx_ref       : (TB, 1)  int32   batch chunk of gather indices
    # mean_tbl_ref  : (N, D)   f32     full mean table (VMEM resident)
    # logsd_tbl_ref : (N, D)   f32     full log-sd table (VMEM resident)
    # z_ref/out_ref : (TB, n_sample*D) f32  lane-dense noise / output chunk
    n_rows, d = mean_tbl_ref.shape
    n_sample = out_ref.shape[-1] // d

    idx = idx_ref[...]                                            # (TB, 1)
    onehot = (idx == jax.lax.broadcasted_iota(
        jnp.int32, (idx.shape[0], n_rows), 1)).astype(jnp.float32)  # (TB, N)

    # One-hot gather on the MXU: exact (products are 0*x or 1*x, f32 accumulate).
    mean = jnp.dot(onehot, mean_tbl_ref[...],
                   preferred_element_type=jnp.float32)            # (TB, D)
    log_sd = jnp.dot(onehot, logsd_tbl_ref[...],
                     preferred_element_type=jnp.float32)          # (TB, D)
    sd = jnp.exp(log_sd)                                          # EUP

    # Broadcast across the folded n_sample axis -> lane-dense FMA + store.
    mean_t = jnp.tile(mean, (1, n_sample))                        # (TB, n_sample*D)
    sd_t = jnp.tile(sd, (1, n_sample))
    out_ref[...] = mean_t + z_ref[...] * sd_t


def _pick_block_b(B, n_sample, D, *, tile_budget_bytes=8 << 20):
    """Largest batch tile that keeps double-buffered z+out tiles within budget
    and satisfies the (8, 128) block constraint (TB % 8 == 0 or TB == B)."""
    per_row = 2 * 2 * n_sample * D * 4  # z + out, double-buffered, f32
    cap = max(8, tile_budget_bytes // max(per_row, 1))
    if B <= cap:
        return B
    tb = (min(cap, B) // 8) * 8
    while tb >= 8 and B % tb != 0:
        tb -= 8
    return tb if tb >= 8 else B


def prior_encoder_forward(indices, mean_values, log_sd_values, z):
    """indices: int32[B]; mean_values/log_sd_values: f32[N, D]; z: f32[B, n_sample, D]."""
    B = indices.shape[0]
    N, D = mean_values.shape
    n_sample = z.shape[1]

    # Lane-dense layout: fold n_sample into the last (lane) axis.
    z2 = z.reshape(B, n_sample * D)
    idx2 = indices.reshape(B, 1).astype(jnp.int32)

    tb = _pick_block_b(B, n_sample, D)
    grid = (B // tb,)

    grid_spec = pltpu.PrefetchScalarGridSpec(
        num_scalar_prefetch=0,
        grid=grid,
        in_specs=[
            pl.BlockSpec((tb, 1), lambda i: (i, 0)),               # index chunk
            pl.BlockSpec((N, D), lambda i: (0, 0)),                # full mean table
            pl.BlockSpec((N, D), lambda i: (0, 0)),                # full log-sd table
            pl.BlockSpec((tb, n_sample * D), lambda i: (i, 0)),    # noise chunk
        ],
        out_specs=pl.BlockSpec((tb, n_sample * D), lambda i: (i, 0)),
    )

    out2 = pl.pallas_call(
        _prior_encoder_kernel,
        out_shape=jax.ShapeDtypeStruct((B, n_sample * D), jnp.float32),
        grid_spec=grid_spec,
        compiler_params=pltpu.CompilerParams(
            dimension_semantics=("parallel",)),  # independent output chunks
    )(idx2, mean_values, log_sd_values, z2)

    return out2.reshape(B, n_sample, D)


if __name__ == "__main__":
    # Module config (synthetic, deterministic): dim = (N, D)
    N, D = 16, 32          # Select parameter table: values ~ randn(N, D) / sqrt(N*D)
    B = 8                  # number of indices in the forward call
    n_sample = 4

    key = jax.random.PRNGKey(0)
    k_mean, k_idx, k_z = jax.random.split(key, 3)

    bound = 1.0 / jnp.sqrt(jnp.float32(N * D))
    mean_values = jax.random.normal(k_mean, (N, D), dtype=jnp.float32) * bound
    # PriorEncoder.__init__ fills log_sd_encoder.values with -2.0
    log_sd_values = jnp.full((N, D), -2.0, dtype=jnp.float32)

    indices = jax.random.randint(k_idx, (B,), 0, N, dtype=jnp.int32)
    # z = torch.randn(...) in the reference; generated here in plain JAX (glue)
    z = jax.random.normal(k_z, (B, n_sample, D), dtype=jnp.float32)

    x = prior_encoder_forward(indices, mean_values, log_sd_values, z)
    x = jax.block_until_ready(x)

    # correctness check against a pure-JAX reference of the same forward
    ref = (mean_values[indices][:, None, :]
           + z * jnp.exp(log_sd_values[indices])[:, None, :])
    assert x.shape == (B, n_sample, D)
    assert jnp.allclose(x, ref, atol=1e-5, rtol=1e-5), float(jnp.max(jnp.abs(x - ref)))

    print("KERNEL_OK")
</pallas_src>

<mosaic_0001>
module attributes {stable_mosaic.version = 11 : i64} {
  func.func @_prior_encoder_kernel(%arg0: i32, %arg1: memref<8x1xi32, #tpu.memory_space<vmem>>, %arg2: memref<16x32xf32, #tpu.memory_space<vmem>>, %arg3: memref<16x32xf32, #tpu.memory_space<vmem>>, %arg4: memref<8x128xf32, #tpu.memory_space<vmem>>, %arg5: memref<8x128xf32, #tpu.memory_space<vmem>>) attributes {dimension_semantics = [#tpu.dimension_semantics<parallel>], iteration_bounds = array<i64: 1>, scalar_prefetch = 0 : i64, scratch_operands = 0 : i64, tpu.core_type = #tpu.core_type<tc>, window_params = [{transform_indices = @transform_0, window_bounds = array<i64: 8, 1>}, {pipeline_mode = #tpu.pipeline_mode<synchronous>, transform_indices = @transform_1, window_bounds = array<i64: 16, 32>}, {pipeline_mode = #tpu.pipeline_mode<synchronous>, transform_indices = @transform_2, window_bounds = array<i64: 16, 32>}, {transform_indices = @transform_3, window_bounds = array<i64: 8, 128>}, {transform_indices = @transform_4, window_bounds = array<i64: 8, 128>}]} {
    %c0 = arith.constant 0 : index
    %c0_0 = arith.constant 0 : index
    %0 = vector.load %arg1[%c0, %c0_0] : memref<8x1xi32, #tpu.memory_space<vmem>>, vector<8x1xi32>
    %1 = tpu.iota {dimensions = array<i32: 1>} : vector<8x16xi32>
    %2 = vector.broadcast %0 : vector<8x1xi32> to vector<8x16xi32>
    %3 = arith.cmpi eq, %2, %1 : vector<8x16xi32>
    %4 = arith.extui %3 : vector<8x16xi1> to vector<8x16xi32>
    %5 = arith.sitofp %4 : vector<8x16xi32> to vector<8x16xf32>
    %c0_1 = arith.constant 0 : index
    %c0_2 = arith.constant 0 : index
    %6 = vector.load %arg2[%c0_1, %c0_2] : memref<16x32xf32, #tpu.memory_space<vmem>>, vector<16x32xf32>
    %cst = arith.constant dense<0.000000e+00> : vector<8x32xf32>
    %7 = tpu.matmul %5, %6, %cst {dimension_numbers = #tpu.dot_dimension_numbers<[1], [0], [0], [1], [0, 0, 1, 1], [], []>} : vector<8x16xf32>, vector<16x32xf32>, vector<8x32xf32> -> vector<8x32xf32>
    %c0_3 = arith.constant 0 : index
    %c0_4 = arith.constant 0 : index
    %8 = vector.load %arg3[%c0_3, %c0_4] : memref<16x32xf32, #tpu.memory_space<vmem>>, vector<16x32xf32>
    %cst_5 = arith.constant dense<0.000000e+00> : vector<8x32xf32>
    %9 = tpu.matmul %5, %8, %cst_5 {dimension_numbers = #tpu.dot_dimension_numbers<[1], [0], [0], [1], [0, 0, 1, 1], [], []>} : vector<8x16xf32>, vector<16x32xf32>, vector<8x32xf32> -> vector<8x32xf32>
    %10 = math.exp %9 : vector<8x32xf32>
    %11 = tpu.concatenate %7, %7, %7, %7 in 1 : vector<8x32xf32>, vector<8x32xf32>, vector<8x32xf32>, vector<8x32xf32> -> vector<8x128xf32>
    %12 = tpu.concatenate %10, %10, %10, %10 in 1 : vector<8x32xf32>, vector<8x32xf32>, vector<8x32xf32>, vector<8x32xf32> -> vector<8x128xf32>
    %c0_6 = arith.constant 0 : index
    %c0_7 = arith.constant 0 : index
    %13 = vector.load %arg4[%c0_6, %c0_7] : memref<8x128xf32, #tpu.memory_space<vmem>>, vector<8x128xf32>
    %14 = arith.mulf %13, %12 : vector<8x128xf32>
    %15 = arith.addf %11, %14 : vector<8x128xf32>
    %c0_8 = arith.constant 0 : index
    %c0_9 = arith.constant 0 : index
    %16 = vector.load %arg5[%c0_8, %c0_9] : memref<8x128xf32, #tpu.memory_space<vmem>>, vector<8x128xf32>
    tpu.vector_store %arg5[%c0_8, %c0_9], %15 {strides = array<i32>} : memref<8x128xf32, #tpu.memory_space<vmem>>, vector<8x128xf32>,
    return
  }
  func.func @transform_0(%arg0: i32) -> (i32, i32) {
    %c0_i32 = arith.constant 0 : i32
    %c0_i32_0 = arith.constant 0 : i32
    return %arg0, %c0_i32 : i32, i32
  }
  func.func @transform_1(%arg0: i32) -> (i32, i32) {
    %c0_i32 = arith.constant 0 : i32
    %c0_i32_0 = arith.constant 0 : i32
    %c0_i32_1 = arith.constant 0 : i32
    return %c0_i32, %c0_i32_0 : i32, i32
  }
  func.func @transform_2(%arg0: i32) -> (i32, i32) {
    %c0_i32 = arith.constant 0 : i32
    %c0_i32_0 = arith.constant 0 : i32
    %c0_i32_1 = arith.constant 0 : i32
    return %c0_i32, %c0_i32_0 : i32, i32
  }
  func.func @transform_3(%arg0: i32) -> (i32, i32) {
    %c0_i32 = arith.constant 0 : i32
    %c0_i32_0 = arith.constant 0 : i32
    return %arg0, %c0_i32 : i32, i32
  }
  func.func @transform_4(%arg0: i32) -> (i32, i32) {
    %c0_i32 = arith.constant 0 : i32
    %c0_i32_0 = arith.constant 0 : i32
    return %arg0, %c0_i32 : i32, i32
  }
}

</mosaic_0001>

<bundles_post_ra>
// kernel: tpu_custom_call.1
= control target key start
LH: loop header
LB: loop body
LE: loop exit
PB: predicated region body
PF: predicated region fallthrough
CT: control target
= control target key end

     0   :  { %9 = vsyncpa [#allocation3], 0  ;;  %s450_s0 = inlined_call_operand.vmem [shape: s32[8,1], index: 0, kind: input, shape index: {}]   ;;  %s451_s1 = inlined_call_operand.hbm [shape: f32[16,32], index: 1, kind: input, shape index: {}]   ;;  %s452_s2 = inlined_call_operand.vmem [shape: f32[16,32], index: 2, kind: input, shape index: {}]   ;;  %s453_s3 = inlined_call_operand.hbm [shape: f32[8,128], index: 3, kind: input, shape index: {}]   ;;  %s454_s4 = inlined_call_operand.hbm [shape: f32[8,128], index: 4, kind: output, shape index: {}]  }
   0x1   :  { %10 = vsyncpa [#allocation6], 0 }
   0x2   :  { %11 = vsyncpa [#allocation4], 0  ;;  %s368_s15 = smov [#allocation2]   ;;  %s296_s19 = scalar_lea.hbm %s451_s1, 256 }
   0x3   :  { %s19_s16 = sshll.u32 %s368_s15, 4  ;;  %p297_p0 = scmp.ne.s32.totalorder %s451_s1, %s296_s19  ;;  %s20_s16 = int_to_ptr.vmem [resolvable:$true] %s19_s16 }
   0x4   :  { %p300_p1 = scmp.lt.u32.totalorder %s296_s19, %s451_s1 }
   0x6   :  { %p302_p2 = pnand %p300_p1, %p297_p0 }
   0x8   :  { %305 = shalt.err (!%p302_p2)
}
   0x9   :  { %s306_s24 = scalar_lea.vmem %s20_s16, 256  ;;  %p311_p4 = scmp.lt.s32.totalorder %s20_s16, %s20_s16 }
   0xa   :  { %p307_p3 = scmp.ne.s32.totalorder %s20_s16, %s306_s24  ;;  %p312_p5 = scmp.lt.s32.totalorder %s306_s24, %s306_s24 }
   0xc   :  { %p313_p6 = por %p312_p5, %p311_p4 }
   0xe   :  { %p314_p7 = pnand %p313_p6, %p307_p3 }
  0x10   :  { %317 = shalt.err (!%p314_p7)
}
  0x11   :  { %s369_s25 = smov 128   ;;  %s370_s26 = smov 8  }
  0x12   :  { %25 = dma.hbm_to_vmem [thread:$0]  %s451_s1, 256, %s20_s16, [#allocation3], %s369_s25, %s369_s25, %s370_s26  }
  0x13   :  { %s371_s29 = smov [#allocation5]   ;;  %s318_s7 = scalar_lea.hbm %s453_s3, 128 }
  0x14   :  { %s34_s30 = sshll.u32 %s371_s29, 4  ;;  %p319_p8 = scmp.ne.s32.totalorder %s453_s3, %s318_s7  ;;  %s35_s30 = int_to_ptr.vmem [resolvable:$true] %s34_s30 }
  0x15   :  { %p322_p9 = scmp.lt.u32.totalorder %s318_s7, %s453_s3 }
  0x17   :  { %p324_p10 = pnand %p322_p9, %p319_p8 }
  0x19   :  { %327 = shalt.err (!%p324_p10)
}
  0x1a   :  { %s328_s12 = scalar_lea.vmem %s35_s30, 128  ;;  %p333_p12 = scmp.lt.s32.totalorder %s35_s30, %s35_s30 }
  0x1b   :  { %p329_p11 = scmp.ne.s32.totalorder %s35_s30, %s328_s12  ;;  %p334_p13 = scmp.lt.s32.totalorder %s328_s12, %s328_s12 }
  0x1d   :  { %p335_p0 = por %p334_p13, %p333_p12 }
  0x1f   :  { %p336_p1 = pnand %p335_p0, %p329_p11 }
  0x21   :  { %339 = shalt.err (!%p336_p1)
}
  0x22   :  { %37 = dma.hbm_to_vmem [thread:$0]  %s453_s3, 128, %s35_s30, [#allocation6]  }
  0x23   :  { %362 = dma.done.wait [#allocation3], 256  }
  0x24   :  { %363 = vsyncadd [#allocation3], 4294967040 }
  0x25   :  { %364 = dma.done.wait [#allocation6], 128  }
  0x26   :  { %365 = vsyncadd [#allocation6], 4294967168  ;;  %v372_v0 = vmov 0   ;;  %v373_v1 = vmov 0.0|0.0   ;;  %v44_v2 = vld [vmem:[%s450_s0] sm:$0xff]  ;;  %v53_v3 = vld [vmem:[#allocation2] sm:$0xff]  ;;  %v45_v10 = vlaneseq }
  0x27   :  { %293 = vset.pattern.permute.xlu0 %v372_v0  ;;  %275 = vmatprep.subr.bf16.mxu0 %v373_v1  ;;  %v54_v4 = vld [vmem:[#allocation2 + $0x8] sm:$0xff]  ;;  %v130_v7 = vld [vmem:[%s452_s2 + $0x8] sm:$0xff]  ;;  %vm374_vm0 = vmmov 0   ;;  %v375_v9 = vmov 0.0   ;;  %vm55_vm1 = vcmask 130048   ;;  %s376_s0 = smov 32  }
  0x28   :  { %278 = vmatprep.subr.bf16.mxu1 %v373_v1  ;;  %48 = vperm.xlu0 %293, %v44_v2   ;;  %v276_v5 = vpack.c.bf16 %v54_v4, %v53_v3  ;;  %v129_v6 = vld [vmem:[%s452_s2] sm:$0xff]  ;;  %v46_v11 = vand.u32 127, %v45_v10  ;;  %s377_s2 = smov 64   ;;  %s378_s19 = smov 96   ;;  %vm213_vm3 = vcmask 261120   ;;  %vm215_vm4 = vcmask 523264  }
  0x29   :  { %v279_v8 = vpack.c.bf16 %v130_v7, %v129_v6  ;;  %265 = vmatprep.mubr.msk.f32.mxu0 %vm374_vm0, %v375_v9  ;;  %272 = vmatprep.mubr.msk.f32.mxu1 %vm374_vm0, %v375_v9  ;;  %vm217_vm5 = vcmask 785408   ;;  %v232_v26 = vld [vmem:[#allocation5] sm:$0xff]  ;;  %s379_s20 = smov [#allocation7]  }
  0x2a   :  { %277 = vmatpush3.bf16.msra.mxu0 %v276_v5  ;;  %s242_s21 = sshll.u32 %s379_s20, 4  ;;  %s243_s21 = int_to_ptr.vmem [resolvable:$true] %s242_s21 }
  0x2b   :  { %280 = vmatpush3.bf16.msra.mxu1 %v279_v8  ;;  %s340_s22 = scalar_lea.vmem %s243_s21, 128  ;;  %p345_p3 = scmp.lt.s32.totalorder %s243_s21, %s243_s21 }
  0x2c   :  { %p341_p2 = scmp.ne.s32.totalorder %s243_s21, %s340_s22  ;;  %p346_p4 = scmp.lt.s32.totalorder %s340_s22, %s340_s22 }
  0x2e   :  { %p347_p5 = por %p346_p4, %p345_p3 }
  0x30   :  { %p348_p6 = pnand %p347_p5, %p341_p2 }
  0xa7   :  { %v49_v12 = vpop.permute.xlu0 %48 }
  0xa8   :  { %vm50_vm2 = vcmp.eq.s32.totalorder %v49_v12, %v46_v11 }
  0xa9   :  { %v252_v13 = vsel %vm50_vm2, 1.0, %v375_v9 }
  0xaa   :  { %266 = vmatmul.mubr.msk.f32.vlgmr.msra.gmra.mrb[0].mxu0 %vm55_vm1, %v252_v13  ;;  %273 = vmatmul.mubr.msk.f32.vlgmr.msra.gmra.mrb[0].mxu1 %vm55_vm1, %v252_v13 }
 0x17d   :  { %v125_v14 = vpop.f32.mrb[0].mxu0  ;;  %v197_v15 = vpop.f32.mrb[0].mxu1 }
 0x17e   :  { %v201_v16 = vmul.f32 1.442695, %v197_v15  ;;  %v274_v17 = vpop.f32.mrb[1].mxu1  ;;  %204 = vrot.lane.b32.xlu1 %v125_v14, %s376_s0  ;;  %v267_v18 = vpop.f32.mrb[1].mxu0 }
 0x180   :  { %294 = vpow2.f32 %v201_v16 }
 0x18a   :  { %v295_v19 = vpop.eup %294 }
 0x18b   :  { %220 = vrot.lane.b32.xlu0 %v295_v19, %s376_s0  ;;  %223 = vrot.lane.b32.xlu1 %v295_v19, %s377_s2 }
 0x18f   :  { %226 = vrot.lane.b32.xlu0 %v295_v19, %s378_s19  ;;  %207 = vrot.lane.b32.xlu1 %v125_v14, %s377_s2 }
 0x193   :  { %210 = vrot.lane.b32.xlu0 %v125_v14, %s378_s19 }
 0x1f0   :  { %v205_v20 = vpop.permute.xlu1 %204 }
 0x1f1   :  { %v214_v29 = vsel %vm213_vm3, %v125_v14, %v205_v20 }
 0x1fd   :  { %v221_v21 = vpop.permute.xlu0 %220  ;;  %v224_v22 = vpop.permute.xlu1 %223 }
 0x1fe   :  { %v229_v23 = vsel %vm213_vm3, %v295_v19, %v221_v21 }
 0x1ff   :  { %v230_v24 = vsel %vm215_vm4, %v229_v23, %v224_v22 }
 0x201   :  { %v227_v25 = vpop.permute.xlu0 %226  ;;  %v208_v28 = vpop.permute.xlu1 %207 }
 0x202   :  { %v231_v27 = vsel %vm217_vm5, %v230_v24, %v227_v25  ;;  %v216_v31 = vsel %vm215_vm4, %v214_v29, %v208_v28 }
 0x203   :  { %v233_v30 = vmul.f32 %v232_v26, %v231_v27 }
 0x205   :  { %v211_v32 = vpop.permute.xlu0 %210 }
 0x206   :  { %v218_v33 = vsel %vm217_vm5, %v216_v31, %v211_v32 }
 0x207   :  { %v234_v34 = vadd.f32 %v233_v30, %v218_v33 }
 0x209   :  { %235 = vst [vmem:[#allocation7] sm:$0xff] %v234_v34 }
 0x20a   :  { %351 = shalt.err (!%p348_p6)
}
 0x20b   :  { %s352_s25 = scalar_lea.hbm %s454_s4, 128 }
 0x20c   :  { %p353_p7 = scmp.ne.s32.totalorder %s454_s4, %s352_s25  ;;  %p356_p8 = scmp.lt.u32.totalorder %s352_s25, %s454_s4 }
 0x20e   :  { %p358_p9 = pnand %p356_p8, %p353_p7 }
 0x210   :  { %361 = shalt.err (!%p358_p9)
}
 0x211   :  { %245 = dma.vmem_to_hbm [thread:$0]  %s243_s21, 128, %s454_s4, [#allocation4]  }
 0x212   :  { %366 = dma.done.wait [#allocation4], 128  }
 0x213   :  { %367 = vsyncadd [#allocation4], 4294967168 }
 0x214   :  { %249 = vsyncpa [#allocation3], 1 }
 0x215   :  { %250 = vsyncpa [#allocation6], 1 }
 0x216   :  { %251 = vsyncpa [#allocation4], 1 }

</bundles_post_ra>
